<compile_context>
chip_gen: v7x
topology: tpu7x:2x2x1
jax: 0.10.0
libtpu: 0.0.40
codegen_flags: <defaults>
</compile_context>

<pallas_src>
import functools

import jax
import jax.numpy as jnp
from jax import lax
from jax.experimental import pallas as pl
from jax.experimental.pallas import tpu as pltpu


# ----------------------------------------------------------------------------
# Helpers / sizing
# ----------------------------------------------------------------------------
def _round_up(x: int, m: int) -> int:
    return ((x + m - 1) // m) * m


def _vmem_table_bytes(n_rows: int, width: int) -> int:
    # f32 VMEM layout pads the last dim to 128 lanes and rows to 8 sublanes.
    return _round_up(max(n_rows, 1), 8) * _round_up(width, 128) * 4


# Conservative cross-generation budget for keeping BOTH augmented tables
# resident in VMEM (they are double-buffered by the BlockSpec pipeline, and
# v7x only has 64 MiB of VMEM per TensorCore).  On v5e/v6e (128 MiB) this
# could be raised (e.g. via pltpu.get_tpu_info().vmem_capacity_bytes).
_RESIDENT_TABLE_BUDGET = 12 * 1024 * 1024


def augment_tables(user_emb, user_bias, item_emb, item_bias):
    """Fold biases into augmented tables.  Call ONCE at init time and cache.

    u_aug = [user_emb | user_bias | 1],  v_aug = [item_emb | 1 | item_bias]
    so (u_aug * v_aug).sum(-1) == u.v + u_bias + v_bias exactly (one row per
    example).  Width is padded with zeros to a multiple of 8 lanes only.
    """
    n_users, f = user_emb.shape
    n_items = item_emb.shape[0]
    fp = _round_up(f + 2, 8)

    ua = jnp.zeros((n_users, fp), jnp.float32)
    ua = ua.at[:, :f].set(user_emb.astype(jnp.float32))
    ua = ua.at[:, f].set(user_bias.astype(jnp.float32).reshape(n_users))
    ua = ua.at[:, f + 1].set(1.0)

    ia = jnp.zeros((n_items, fp), jnp.float32)
    ia = ia.at[:, :f].set(item_emb.astype(jnp.float32))
    ia = ia.at[:, f].set(1.0)
    ia = ia.at[:, f + 1].set(item_bias.astype(jnp.float32).reshape(n_items))
    return ua, ia


# ----------------------------------------------------------------------------
# Kernel 1: VMEM-resident tables (small / medium tables) — no per-row DMAs.
# ----------------------------------------------------------------------------
def _mf_resident_kernel(u_ids_ref, i_ids_ref, ua_ref, ia_ref, out_ref,
                        u_buf, v_buf, *, tb):
    """One grid step handles TB (user, item) pairs.

    u_ids_ref / i_ids_ref : (Bp,) int32 in SMEM (scalar prefetch)
    ua_ref / ia_ref       : (n_users|n_items, Fp) f32, whole table in VMEM
    out_ref               : (1, TB) f32 VMEM block (lane-dense)
    u_buf / v_buf         : (TB, Fp) f32 VMEM scratch (gathered rows)
    """
    base = pl.program_id(0) * tb

    # In-VMEM gather: dynamic row loads/stores along the first axis, rolled in
    # a fori_loop (no unrolled code blow-up, no DMA descriptors, no waits).
    def gather(r, carry):
        u_buf[r] = ua_ref[u_ids_ref[base + r]]
        v_buf[r] = ia_ref[i_ids_ref[base + r]]
        return carry

    lax.fori_loop(0, tb, gather, 0)

    # (u_aug * v_aug).sum(-1) == u.v + u_bias + v_bias  (padded lanes are 0).
    prod = u_buf[...] * v_buf[...]                        # (TB, Fp) f32, VPU
    # Lane reduce + (TB,)->(1,TB) relayout go through the XLU; acceptable here
    # since the per-step cost is dominated by the gather loop.
    out_ref[...] = jnp.sum(prod, axis=1).reshape(1, tb)   # lane-dense store


# ----------------------------------------------------------------------------
# Kernel 2: HBM-resident tables (large tables) — double-buffered DMA gather.
# ----------------------------------------------------------------------------
def _mf_gather_kernel(u_ids_ref, i_ids_ref, ua_hbm, ia_hbm, out_ref,
                      u_buf, v_buf, sem, *, tb):
    """One grid step handles TB (user, item) pairs.

    ua_hbm / ia_hbm : (n_users|n_items, Fp) f32 resident in HBM (pl.ANY)
    u_buf / v_buf   : (2, TB, Fp) f32 VMEM scratch (double-buffered gathers)
    sem             : (2, 2) DMA semaphores, [table stream, slot]
    Grid axis is "arbitrary" (sequential): chunk c+1's gathers are issued into
    slot (c+1)%2 before chunk c's slot is drained, hiding the HBM latency.
    """
    c = pl.program_id(0)
    nc = pl.num_programs(0)
    slot = c % 2

    def issue_chunk(chunk, s):
        # Issue all 2*TB row gathers for `chunk` into slot `s`.  Starts only —
        # they are drained later with a single byte-counting wait per stream.
        base = chunk * tb

        def body(r, carry):
            u_row = u_ids_ref[base + r]
            i_row = i_ids_ref[base + r]
            pltpu.make_async_copy(ua_hbm.at[pl.ds(u_row, 1)],
                                  u_buf.at[s, pl.ds(r, 1)],
                                  sem.at[0, s]).start()
            pltpu.make_async_copy(ia_hbm.at[pl.ds(i_row, 1)],
                                  v_buf.at[s, pl.ds(r, 1)],
                                  sem.at[1, s]).start()
            return carry

        lax.fori_loop(0, tb, body, 0)

    # Prime the pipeline with chunk 0 on the first step.
    @pl.when(c == 0)
    def _():
        issue_chunk(0, 0)

    # Prefetch the next chunk into the other slot before draining this one.
    @pl.when(c + 1 < nc)
    def _():
        issue_chunk(c + 1, 1 - slot)

    # One wait per stream: DMA semaphores count bytes, so a wait sized to the
    # full (TB, Fp) slot drains all TB row copies issued on that semaphore.
    pltpu.make_async_copy(u_buf.at[slot], u_buf.at[slot], sem.at[0, slot]).wait()
    pltpu.make_async_copy(v_buf.at[slot], v_buf.at[slot], sem.at[1, slot]).wait()

    prod = u_buf[slot] * v_buf[slot]                      # (TB, Fp) f32, VPU
    out_ref[...] = jnp.sum(prod, axis=1).reshape(1, tb)   # lane-dense store


# ----------------------------------------------------------------------------
# Wrapper
# ----------------------------------------------------------------------------
def mf_forward_augmented(user, item, ua, ia, *, force_path=None):
    """user, item: int [B]; ua/ia: cached augmented tables from augment_tables."""
    B = int(user.shape[0])
    n_users, fp = ua.shape
    n_items = ia.shape[0]

    resident_bytes = _vmem_table_bytes(n_users, fp) + _vmem_table_bytes(n_items, fp)
    use_resident = resident_bytes <= _RESIDENT_TABLE_BUDGET
    if force_path == "resident":
        use_resident = True
    elif force_path == "gather":
        use_resident = False

    # --- Batch tiling: lane-dense (1, Bp) output, (1, TB) blocks ------------
    if B <= 128:
        tb = B          # single chunk; block == full array (masked store OK)
    elif B <= 1024:
        tb = 128        # >= 2 chunks so a v7x megacore splits the batch
    else:
        tb = 512        # amortize per-step overhead; multiple unmasked stores
    bp = _round_up(B, tb)
    num_chunks = bp // tb

    # Clamp indices (defensive: an OOB id must not OOB a gather) and pad the
    # batch with index 0; padded lanes are sliced away below.
    u_idx = jnp.zeros((bp,), jnp.int32).at[:B].set(
        jnp.clip(user.astype(jnp.int32), 0, n_users - 1))
    i_idx = jnp.zeros((bp,), jnp.int32).at[:B].set(
        jnp.clip(item.astype(jnp.int32), 0, n_items - 1))

    if use_resident:
        out = pl.pallas_call(
            functools.partial(_mf_resident_kernel, tb=tb),
            out_shape=jax.ShapeDtypeStruct((1, bp), jnp.float32),
            grid_spec=pltpu.PrefetchScalarGridSpec(
                num_scalar_prefetch=2,
                grid=(num_chunks,),
                in_specs=[pl.BlockSpec((n_users, fp), lambda c, u, i: (0, 0)),
                          pl.BlockSpec((n_items, fp), lambda c, u, i: (0, 0))],
                out_specs=pl.BlockSpec((1, tb), lambda c, u, i: (0, c)),
                scratch_shapes=[pltpu.VMEM((tb, fp), jnp.float32),
                                pltpu.VMEM((tb, fp), jnp.float32)]),
            compiler_params=pltpu.CompilerParams(
                dimension_semantics=("parallel",),       # batch chunks -> both TCs
                vmem_limit_bytes=48 * 1024 * 1024),      # safe on v7x's 64 MiB
        )(u_idx, i_idx, ua, ia)
    else:
        out = pl.pallas_call(
            functools.partial(_mf_gather_kernel, tb=tb),
            out_shape=jax.ShapeDtypeStruct((1, bp), jnp.float32),
            grid_spec=pltpu.PrefetchScalarGridSpec(
                num_scalar_prefetch=2,
                grid=(num_chunks,),
                in_specs=[pl.BlockSpec(memory_space=pl.ANY),   # user table in HBM
                          pl.BlockSpec(memory_space=pl.ANY)],  # item table in HBM
                out_specs=pl.BlockSpec((1, tb), lambda c, u, i: (0, c)),
                scratch_shapes=[pltpu.VMEM((2, tb, fp), jnp.float32),
                                pltpu.VMEM((2, tb, fp), jnp.float32),
                                pltpu.SemaphoreType.DMA((2, 2))]),
            compiler_params=pltpu.CompilerParams(
                # Cross-step double-buffered prefetch carries scratch state
                # between consecutive chunks -> keep this axis sequential.
                dimension_semantics=("arbitrary",),
                vmem_limit_bytes=32 * 1024 * 1024),
        )(u_idx, i_idx, ua, ia)

    return out.reshape(bp)[:B]


def mf_with_bias_forward(user, item, user_emb, user_bias, item_emb, item_bias):
    """Drop-in forward taking raw parameters.

    NOTE(perf): augment_tables is O(n_table * F) — in real use call it once at
    parameter-init time and reuse `mf_forward_augmented` (as the demo does).
    """
    ua, ia = augment_tables(user_emb, user_bias, item_emb, item_bias)
    return mf_forward_augmented(user, item, ua, ia)


# ----------------------------------------------------------------------------
# Demo / correctness check
# ----------------------------------------------------------------------------
if __name__ == "__main__":
    n_users, n_items, n_factors = 64, 128, 32

    key = jax.random.PRNGKey(0)
    k_ue, k_ub, k_ie, k_ib, k_u, k_i, k_u2, k_i2 = jax.random.split(key, 8)

    # Deterministic parameter init matching the PyTorch module's __init__ ranges.
    user_emb = jax.random.uniform(k_ue, (n_users, n_factors), jnp.float32, 0.0, 0.05)
    item_emb = jax.random.uniform(k_ie, (n_items, n_factors), jnp.float32, 0.0, 0.05)
    user_bias = jax.random.uniform(k_ub, (n_users, 1), jnp.float32, -0.01, 0.01)
    item_bias = jax.random.uniform(k_ib, (n_items, 1), jnp.float32, -0.01, 0.01)

    def reference(user, item):
        u = user_emb[user]
        v = item_emb[item]
        return (u * v).sum(axis=1) + user_bias[user, 0] + item_bias[item, 0]

    # --- 1) drop-in wrapper, tiny batch (single chunk) ----------------------
    batch = 8
    user = jax.random.randint(k_u, (batch,), 0, n_users, dtype=jnp.int32)
    item = jax.random.randint(k_i, (batch,), 0, n_items, dtype=jnp.int32)
    out = jax.block_until_ready(
        mf_with_bias_forward(user, item, user_emb, user_bias, item_emb, item_bias))
    assert out.shape == (batch,)
    assert jnp.allclose(out, reference(user, item), atol=1e-5, rtol=1e-5)

    # --- 2) cached augmented tables (init-time), multi-chunk batch ----------
    ua, ia = augment_tables(user_emb, user_bias, item_emb, item_bias)  # cache once
    batch2 = 300
    user2 = jax.random.randint(k_u2, (batch2,), 0, n_users, dtype=jnp.int32)
    item2 = jax.random.randint(k_i2, (batch2,), 0, n_items, dtype=jnp.int32)
    out2 = jax.block_until_ready(mf_forward_augmented(user2, item2, ua, ia))
    assert out2.shape == (batch2,)
    assert jnp.allclose(out2, reference(user2, item2), atol=1e-5, rtol=1e-5)

    print("KERNEL_OK")
</pallas_src>

<mosaic_0001>
module attributes {stable_mosaic.version = 11 : i64} {
  func.func @_mf_resident_kernel(%arg0: i32, %arg1: memref<8xi32, #tpu.memory_space<smem>>, %arg2: memref<8xi32, #tpu.memory_space<smem>>, %arg3: memref<64x40xf32, #tpu.memory_space<vmem>>, %arg4: memref<128x40xf32, #tpu.memory_space<vmem>>, %arg5: memref<1x8xf32, #tpu.memory_space<vmem>>, %arg6: memref<8x40xf32, #tpu.memory_space<vmem>>, %arg7: memref<8x40xf32, #tpu.memory_space<vmem>>) attributes {dimension_semantics = [#tpu.dimension_semantics<parallel>], iteration_bounds = array<i64: 1>, scalar_prefetch = 2 : i64, scratch_operands = 2 : i64, tpu.core_type = #tpu.core_type<tc>, window_params = [{pipeline_mode = #tpu.pipeline_mode<synchronous>, transform_indices = @transform_0, window_bounds = array<i64: 64, 40>}, {pipeline_mode = #tpu.pipeline_mode<synchronous>, transform_indices = @transform_1, window_bounds = array<i64: 128, 40>}, {transform_indices = @transform_2, window_bounds = array<i64: 1, 8>}]} {
    %c8_i32 = arith.constant 8 : i32
    %0 = arith.muli %arg0, %c8_i32 : i32
    %c0_i32 = arith.constant 0 : i32
    %c8_i32_0 = arith.constant 8 : i32
    %1 = arith.addi %c0_i32, %c8_i32_0 : i32
    %c1_i32 = arith.constant 1 : i32
    scf.for %arg8 = %c0_i32 to %1 step %c1_i32  : i32 {
      %8 = arith.addi %0, %arg8 : i32
      %9 = arith.index_cast %8 : i32 to index
      %10 = memref.load %arg1[%9] : memref<8xi32, #tpu.memory_space<smem>>
      %11 = arith.index_cast %10 : i32 to index
      %c0_7 = arith.constant 0 : index
      %12 = vector.load %arg3[%11, %c0_7] : memref<64x40xf32, #tpu.memory_space<vmem>>, vector<1x40xf32>
      %13 = vector.shape_cast %12 : vector<1x40xf32> to vector<40xf32>
      %14 = arith.index_cast %arg8 : i32 to index
      %c0_8 = arith.constant 0 : index
      %15 = vector.load %arg6[%14, %c0_8] : memref<8x40xf32, #tpu.memory_space<vmem>>, vector<1x40xf32>
      %16 = vector.shape_cast %15 : vector<1x40xf32> to vector<40xf32>
      %17 = vector.shape_cast %13 : vector<40xf32> to vector<1x40xf32>
      tpu.vector_store %arg6[%14, %c0_8], %17 {strides = array<i32>} : memref<8x40xf32, #tpu.memory_space<vmem>>, vector<1x40xf32>,
      %18 = arith.addi %0, %arg8 : i32
      %19 = arith.index_cast %18 : i32 to index
      %20 = memref.load %arg2[%19] : memref<8xi32, #tpu.memory_space<smem>>
      %21 = arith.index_cast %20 : i32 to index
      %c0_9 = arith.constant 0 : index
      %22 = vector.load %arg4[%21, %c0_9] : memref<128x40xf32, #tpu.memory_space<vmem>>, vector<1x40xf32>
      %23 = vector.shape_cast %22 : vector<1x40xf32> to vector<40xf32>
      %24 = arith.index_cast %arg8 : i32 to index
      %c0_10 = arith.constant 0 : index
      %25 = vector.load %arg7[%24, %c0_10] : memref<8x40xf32, #tpu.memory_space<vmem>>, vector<1x40xf32>
      %26 = vector.shape_cast %25 : vector<1x40xf32> to vector<40xf32>
      %27 = vector.shape_cast %23 : vector<40xf32> to vector<1x40xf32>
      tpu.vector_store %arg7[%24, %c0_10], %27 {strides = array<i32>} : memref<8x40xf32, #tpu.memory_space<vmem>>, vector<1x40xf32>,
    }
    %c8_i32_1 = arith.constant 8 : i32
    %c0 = arith.constant 0 : index
    %c0_2 = arith.constant 0 : index
    %2 = vector.load %arg6[%c0, %c0_2] : memref<8x40xf32, #tpu.memory_space<vmem>>, vector<8x40xf32>
    %c0_3 = arith.constant 0 : index
    %c0_4 = arith.constant 0 : index
    %3 = vector.load %arg7[%c0_3, %c0_4] : memref<8x40xf32, #tpu.memory_space<vmem>>, vector<8x40xf32>
    %4 = arith.mulf %2, %3 : vector<8x40xf32>
    %cst = arith.constant dense<0.000000e+00> : vector<8xf32>
    %5 = vector.multi_reduction <add>, %4, %cst [1] : vector<8x40xf32> to vector<8xf32>
    %6 = vector.shape_cast %5 : vector<8xf32> to vector<1x8xf32>
    %c0_5 = arith.constant 0 : index
    %c0_6 = arith.constant 0 : index
    %7 = vector.load %arg5[%c0_5, %c0_6] : memref<1x8xf32, #tpu.memory_space<vmem>>, vector<1x8xf32>
    tpu.vector_store %arg5[%c0_5, %c0_6], %6 {strides = array<i32>} : memref<1x8xf32, #tpu.memory_space<vmem>>, vector<1x8xf32>,
    return
  }
  func.func @transform_0(%arg0: i32, %arg1: memref<8xi32, #tpu.memory_space<smem>>, %arg2: memref<8xi32, #tpu.memory_space<smem>>) -> (i32, i32) {
    %c0_i32 = arith.constant 0 : i32
    %c0_i32_0 = arith.constant 0 : i32
    %c0_i32_1 = arith.constant 0 : i32
    return %c0_i32, %c0_i32_0 : i32, i32
  }
  func.func @transform_1(%arg0: i32, %arg1: memref<8xi32, #tpu.memory_space<smem>>, %arg2: memref<8xi32, #tpu.memory_space<smem>>) -> (i32, i32) {
    %c0_i32 = arith.constant 0 : i32
    %c0_i32_0 = arith.constant 0 : i32
    %c0_i32_1 = arith.constant 0 : i32
    return %c0_i32, %c0_i32_0 : i32, i32
  }
  func.func @transform_2(%arg0: i32, %arg1: memref<8xi32, #tpu.memory_space<smem>>, %arg2: memref<8xi32, #tpu.memory_space<smem>>) -> (i32, i32) {
    %c0_i32 = arith.constant 0 : i32
    %c0_i32_0 = arith.constant 0 : i32
    return %c0_i32, %arg0 : i32, i32
  }
}

</mosaic_0001>

<bundles_post_ra>
// kernel: tpu_custom_call.1
= control target key start
LH: loop header
LB: loop body
LE: loop exit
PB: predicated region body
PF: predicated region fallthrough
CT: control target
= control target key end

     0   :  { %s204_s0 = inlined_call_operand.vmem [shape: s32[8], index: 0, kind: input, shape index: {}]   ;;  %s205_s2 = inlined_call_operand.vmem [shape: f32[64,40], index: 2, kind: input, shape index: {}]   ;;  %s206_s3 = inlined_call_operand.vmem [shape: f32[128,40], index: 3, kind: input, shape index: {}]   ;;  %s207_s4 = inlined_call_operand.hbm [shape: f32[1,8], index: 4, kind: output, shape index: {}]   ;;  %s208_s1 = inlined_call_operand.vmem [shape: s32[8], index: 1, kind: input, shape index: {}]  }
   0x1   :  { %s9_s17 = sshll.u32 %s204_s0, 4  ;;  %s13_s20 = sshll.u32 %s208_s1, 4  ;;  %s10_s17 = int_to_ptr.vmem [resolvable:$true] %s9_s17  ;;  %s14_s20 = int_to_ptr.vmem [resolvable:$true] %s13_s20 }
   0x2   :  { %s94_s21 = scalar_lea.vmem %s10_s17, 16  ;;  %p99_p1 = scmp.lt.s32.totalorder %s10_s17, %s10_s17 }
   0x3   :  { %p95_p0 = scmp.ne.s32.totalorder %s10_s17, %s94_s21  ;;  %p100_p2 = scmp.lt.s32.totalorder %s94_s21, %s94_s21 }
   0x5   :  { %p101_p3 = por %p100_p2, %p99_p1 }
   0x7   :  { %p102_p4 = pnand %p101_p3, %p95_p0 }
   0x9   :  { %105 = shalt.err (!%p102_p4)  }
   0xa   :  { %s152_s22 = smov [#allocation5]   ;;  %s106_s23 = scalar_lea.vmem %s14_s20, 16 }
   0xb   :  { %12 = dma.vmem_to_smem %s10_s17, 16, %s152_s22, [#allocation4] }
   0xc   :  { %p107_p5 = scmp.ne.s32.totalorder %s14_s20, %s106_s23  ;;  %p111_p6 = scmp.lt.s32.totalorder %s14_s20, %s14_s20 }
   0xd   :  { %p112_p7 = scmp.lt.s32.totalorder %s106_s23, %s106_s23 }
   0xf   :  { %p113_p8 = por %p112_p7, %p111_p6 }
  0x11   :  { %p114_p9 = pnand %p113_p8, %p107_p5 }
  0x13   :  { %117 = shalt.err (!%p114_p9)  }
  0x14   :  { %s153_s0 = smov [#allocation6]  }
  0x15   :  { %16 = dma.vmem_to_smem %s14_s20, 16, %s153_s0, [#allocation4] }
  0x16   :  { %144 = dma.done.wait [#allocation4], 32 }
  0x17   :  { %145 = vsyncadd [#allocation4], 4294967264 }
  0x18   :  { %18 = sfence }
  0x19   :  { %19 = vsyncpa [#allocation8], 0  ;;  %s148_s1 = smov 0  }
  0x1a LB: > { %s32_s24 = sld [smem:[#allocation5 + %s150_s1]]  ;;  %vm36_vm0 = vcmask 319488   ;;  %s35_s6 = scalar_lea.vmem [#allocation2], %s150_s1  ;;  %s150_s1 = sphi %s148_s1, %s30_s1  }
  0x1b   : > { %s38_s25 = sld [smem:[#allocation6 + %s150_s1]]  ;;  %s41_s7 = scalar_lea.vmem [#allocation3], %s150_s1 }
  0x1c   : > { %s30_s1 = sadd.s32 1, %s150_s1  }
  0x1d   : > { %p27_p10 = scmp.ge.s32.totalorder %s30_s1, 8  }
  0x1e   :  { %vm46_vm1 = vcmask (%p27_p10), 326656   ;;  %v51_v6 = vlaneseq (%p27_p10)  ;;  %s154_s8 = smov (%p27_p10), [#allocation7]   ;;  %vm58_vm2 = vcmask (%p27_p10), 57344  }
  0x1f   :  { %29 = sbr.rel (!%p27_p10) target bundleno = 26 (0x1a), region = 39  ;;  %s66_s9 = sshll.u32 (%p27_p10), %s154_s8, 4  ;;  %s67_s9 = int_to_ptr.vmem [resolvable:$true] %s66_s9 }
  0x20   : > { %s33_s28 = scalar_lea.vmem %s205_s2, %s32_s24  ;;  %v52_v7 = vand.u32 (%p27_p10), 127, %v51_v6  ;;  %v54_v8 = vshrl.u32 (%p27_p10), %v51_v6, 7  ;;  %s118_s10 = scalar_lea.vmem (%p27_p10), %s67_s9, 16 }
  0x21   : > { %v34_v0 = vld [vmem:[%s33_s28] sm:$0x1]  ;;  %s39_s5 = scalar_lea.vmem %s206_s3, %s38_s25  ;;  %p119_p11 = scmp.ne.s32.totalorder (%p27_p10), %s67_s9, %s118_s10 }
  0x22   : > { %37 = vst.msk [vmem:[%s35_s6] sm:$0x1] %vm36_vm0, %v34_v0  ;;  %v40_v1 = vld [vmem:[%s39_s5] sm:$0x1]  ;;  %v55_v9 = vsub.s32 (%p27_p10), %v52_v7, %v54_v8  ;;  %s122_s11 = scalar_lea.vmem (%p27_p10), %s67_s9, 32  ;;  %p123_p12 = scmp.lt.s32.totalorder (%p27_p10), %s67_s9, %s67_s9 }
  0x23   : > { %42 = vst.msk [vmem:[%s41_s7] sm:$0x1] %vm36_vm0, %v40_v1  ;;  %p124_p13 = scmp.lt.s32.totalorder (%p27_p10), %s122_s11, %s118_s10 }
  0x25   :  { %p125_p0 = por (%p27_p10), %p124_p13, %p123_p12 }
  0x27   :  { %p126_p1 = pnand %p125_p0, %p119_p11 }
  0x29   :  { %v43_v2 = vld [vmem:[#allocation2] sm:$0xff] }
  0x2a   :  { %v44_v3 = vld [vmem:[#allocation3] sm:$0xff] }
  0x2b   :  { %v45_v4 = vmul.f32 %v44_v3, %v43_v2 }
  0x2d   :  { %v47_v5 = vsel %vm46_vm1, %v45_v4, 0.0 }
  0x2e   :  { %48 = vadd.xlane.f32.xlu0 %v47_v5 }
  0xbb   :  { %v49_v10 = vpop.xlane.xlu0 %48 }
  0xbc   :  { %v56_v11 = vrot.slane %v49_v10, %v55_v9 }
  0xbe   :  { %59 = vst.msk [vmem:[#allocation7] sm:$0x1] %vm58_vm2, %v56_v11 }
  0xbf   :  { %129 = shalt.err (!%p126_p1)
}
  0xc0   :  { %s130_s12 = scalar_lea.hbm %s207_s4, 16 }
  0xc1   :  { %p131_p2 = scmp.ne.s32.totalorder %s207_s4, %s130_s12  ;;  %p134_p3 = scmp.lt.u32.totalorder %s130_s12, %s207_s4 }
  0xc3   :  { %p136_p4 = pnand %p134_p3, %p131_p2 }
  0xc5   :  { %139 = shalt.err (!%p136_p4)
}
  0xc6   :  { %69 = dma.vmem_to_hbm [thread:$0]  %s67_s9, 16, %s207_s4, [#allocation8]  }
  0xc7   :  { %146 = dma.done.wait [#allocation8], 16  }
  0xc8   :  { %147 = vsyncadd [#allocation8], 4294967280 }
  0xc9   :  { %73 = vsyncpa [#allocation8], 1 }

</bundles_post_ra>
